<compile_context>
chip_gen: v6e
topology: v6e:2x2x1
jax: 0.10.0
libtpu: 0.0.40
codegen_flags: <defaults>
</compile_context>

<pallas_src>
import functools

import numpy as np

import jax
import jax.numpy as jnp
from jax.experimental import pallas as pl
from jax.experimental.pallas import tpu as pltpu

_EPS = 1e-6
_LANES = 128
_SUBLANES = 8
_CHUNK_ROWS = 32       # rows per register-resident inner chunk (4 vregs / channel)
_MAX_TILE_ROWS = 1024  # rows per grid block: 3*1024*128*4B = 1.5 MiB (x2 buffers)
_MIN_PIPE_ROWS = 512   # force >=2 blocks per slice above this (overlap DMA/compute)
_MIN_PAR_ROWS = 256    # min rows per TensorCore slice before the 2-way split


def _round_up(x, m):
    return (x + m - 1) // m * m


def _nps_kernel(patch_ref, out_ref, *, weights, consts, tile_rows, chunk_rows):
    """One row-block of the NPS reduction.

    patch_ref: VMEM (3, tile_rows, 128)  lane-dense slab of the flattened patch
    out_ref:   VMEM (1, chunk_rows, 128) resident per-lane accumulator (per p)
    """
    j = pl.program_id(1)

    @pl.when(j == 0)
    def _init():
        out_ref[...] = jnp.zeros_like(out_ref)

    n_chunks = tile_rows // chunk_rows
    num_colors = len(consts)

    def chunk_body(c, carry):
        start = c * chunk_rows
        if not isinstance(start, int):
            start = pl.multiple_of(start, chunk_rows)
        r = patch_ref[0, pl.ds(start, chunk_rows), :]
        g = patch_ref[1, pl.ds(start, chunk_rows), :]
        b = patch_ref[2, pl.ds(start, chunk_rows), :]
        s = r * r + g * g + b * b
        w0, w1, w2 = weights[0]
        min_d2 = s - (r * w0 + g * w1 + b * w2) + consts[0]
        for k in range(1, num_colors):           # small static K -> unrolled VPU loop
            w0, w1, w2 = weights[k]
            d2 = s - (r * w0 + g * w1 + b * w2) + consts[k]
            min_d2 = jnp.minimum(min_d2, d2)
        # single sqrt after the min (monotone); clamp guards the reassociated
        # arithmetic against a pathological tiny-negative rounding result.
        return carry + jnp.sqrt(jnp.maximum(min_d2, 0.0))

    zero = jnp.zeros((chunk_rows, _LANES), jnp.float32)
    if n_chunks == 1:
        part = chunk_body(0, zero)
    else:
        part = jax.lax.fori_loop(0, n_chunks, chunk_body, zero,
                                 unroll=2 if n_chunks % 2 == 0 else 1)
    out_ref[...] += part[None]


def make_nps_calculator(printability_rgb):
    """Build an NPS function with the (fixed) printable palette baked in.

    printability_rgb: (K, 3) array-like of printable colors.
    """
    # TODO(synk): the real module parses the printable-color triplets from a
    # text file at __init__; here the palette is passed in directly.
    pa = np.asarray(printability_rgb, dtype=np.float64)
    assert pa.ndim == 2 and pa.shape[1] == 3
    num_colors = pa.shape[0]

    # Strength-reduction constants, computed in f64 then rounded to f32.
    q = pa - _EPS                                          # (K, 3)
    w_tab = np.asarray(2.0 * q, dtype=np.float32)          # (K, 3)
    c_tab = np.asarray(np.sum(q * q, axis=1) + _EPS, dtype=np.float32)   # (K,)
    weights = tuple((float(w_tab[k, 0]), float(w_tab[k, 1]), float(w_tab[k, 2]))
                    for k in range(num_colors))
    consts = tuple(float(c_tab[k]) for k in range(num_colors))
    min_c = min(consts)    # distance^2 of a zero (padded) pixel to its nearest color

    def nps(adv_patch):
        adv_patch = jnp.asarray(adv_patch, jnp.float32)
        if adv_patch.ndim == 4:            # tolerate an explicit leading batch of 1
            adv_patch = jnp.squeeze(adv_patch, axis=0)
        ch, h, wdt = adv_patch.shape
        assert ch == 3
        num_pixels = h * wdt
        numel = 3 * num_pixels             # torch.numel(adv_patch) after unsqueeze

        # Lane-dense tiling of the flattened spatial axis: (3, rows, 128).
        rows = pl.cdiv(num_pixels, _LANES)
        num_par = 2 if rows >= 2 * _MIN_PAR_ROWS else 1        # v7x: one slab per TC
        rows_per_par = pl.cdiv(rows, num_par)
        nblocks = max(1, pl.cdiv(rows_per_par, _MAX_TILE_ROWS))
        if rows_per_par >= 2 * _MIN_PIPE_ROWS:                 # keep DMA pipelined
            nblocks = max(nblocks, 2)
        tile_rows = _round_up(pl.cdiv(rows_per_par, nblocks), _SUBLANES)
        chunk_rows = min(_CHUNK_ROWS, tile_rows)
        tile_rows = _round_up(tile_rows, chunk_rows)
        rows_pad = num_par * nblocks * tile_rows
        n_pad = rows_pad * _LANES - num_pixels

        x = adv_patch.reshape(3, num_pixels)                   # free view (contiguous)
        if n_pad:
            # Zero-pad to the tiling granularity; padded zeros are removed
            # analytically below, so the kernel needs no per-pixel mask.
            x = jnp.pad(x, ((0, 0), (0, n_pad)))
        x = x.reshape(3, rows_pad, _LANES)

        kernel = functools.partial(
            _nps_kernel, weights=weights, consts=consts,
            tile_rows=tile_rows, chunk_rows=chunk_rows)

        partials = pl.pallas_call(
            kernel,
            out_shape=jax.ShapeDtypeStruct((num_par, chunk_rows, _LANES), jnp.float32),
            grid_spec=pltpu.PrefetchScalarGridSpec(
                num_scalar_prefetch=0,
                grid=(num_par, nblocks),
                in_specs=[pl.BlockSpec(
                    (3, tile_rows, _LANES),
                    lambda p, j: (0, p * nblocks + j, 0))],
                out_specs=pl.BlockSpec(
                    (1, chunk_rows, _LANES),
                    lambda p, j: (p, 0, 0)),                   # resident accumulator
            ),
            compiler_params=pltpu.CompilerParams(
                dimension_semantics=("parallel", "arbitrary")),
        )(x)

        total = jnp.sum(partials)
        if n_pad:
            # Every zero-padded pixel contributed exactly sqrt(min_k C_k).
            total = total - n_pad * jnp.sqrt(jnp.float32(min_c))
        return total / numel

    return nps


def _reference_nps(adv_patch, printability_rgb):
    """Pure-JAX mirror of NPSCalculator.forward (PyTorch broadcasting)."""
    x = adv_patch[None]                                     # (1, 3, H, W)
    pa = printability_rgb[:, None, :, None, None]           # (K, 1, 3, 1, 1)
    color_dist = x - pa + 1e-6                               # (K, 1, 3, H, W)
    color_dist = color_dist ** 2
    color_dist = jnp.sum(color_dist, axis=2) + 1e-6          # (K, 1, H, W)
    color_dist = jnp.sqrt(color_dist)
    color_dist_prod = jnp.min(color_dist, axis=0)            # (1, H, W)
    return jnp.sum(color_dist_prod) / x.size


if __name__ == "__main__":
    H, W = 16, 16
    K = 12                                 # small synthetic printable palette
    key = jax.random.PRNGKey(0)
    k_patch, k_colors = jax.random.split(key)
    adv_patch = jax.random.uniform(k_patch, (3, H, W), dtype=jnp.float32)
    printability_rgb = jax.random.uniform(k_colors, (K, 3), dtype=jnp.float32)

    nps_fn = jax.jit(make_nps_calculator(np.asarray(printability_rgb)))
    result = jax.block_until_ready(nps_fn(adv_patch))
    ref = jax.block_until_ready(_reference_nps(adv_patch, printability_rgb))

    assert result.shape == ()
    assert jnp.allclose(result, ref, atol=1e-6, rtol=1e-5), (result, ref)
    print("KERNEL_OK")
</pallas_src>

<mosaic_0001>
module attributes {stable_mosaic.version = 11 : i64} {
  func.func @_nps_kernel(%arg0: i32, %arg1: i32, %arg2: memref<3x8x128xf32, #tpu.memory_space<vmem>>, %arg3: memref<1x8x128xf32, #tpu.memory_space<vmem>>) attributes {dimension_semantics = [#tpu.dimension_semantics<parallel>, #tpu.dimension_semantics<arbitrary>], iteration_bounds = array<i64: 1, 1>, scalar_prefetch = 0 : i64, scratch_operands = 0 : i64, tpu.core_type = #tpu.core_type<tc>, window_params = [{transform_indices = @transform_0, window_bounds = array<i64: 3, 8, 128>}, {transform_indices = @transform_1, window_bounds = array<i64: 1, 8, 128>}]} {
    %c0_i32 = arith.constant 0 : i32
    %0 = arith.cmpi eq, %arg1, %c0_i32 : i32
    %1 = arith.extui %0 : i1 to i32
    %c0_i32_0 = arith.constant 0 : i32
    %2 = arith.cmpi ne, %1, %c0_i32_0 : i32
    scf.if %2 {
      %cst_62 = arith.constant 0.000000e+00 : f32
      %166 = vector.broadcast %cst_62 : f32 to vector<1x8x128xf32>
      %c0_63 = arith.constant 0 : index
      %c0_64 = arith.constant 0 : index
      %c0_65 = arith.constant 0 : index
      %167 = vector.load %arg3[%c0_63, %c0_64, %c0_65] : memref<1x8x128xf32, #tpu.memory_space<vmem>>, vector<1x8x128xf32>
      tpu.vector_store %arg3[%c0_63, %c0_64, %c0_65], %166 {strides = array<i32>} : memref<1x8x128xf32, #tpu.memory_space<vmem>>, vector<1x8x128xf32>,
    } else {
    }
    %cst = arith.constant 0.000000e+00 : f32
    %3 = vector.broadcast %cst : f32 to vector<8x128xf32>
    %c0 = arith.constant 0 : index
    %c0_1 = arith.constant 0 : index
    %c0_2 = arith.constant 0 : index
    %4 = vector.load %arg2[%c0, %c0_1, %c0_2] : memref<3x8x128xf32, #tpu.memory_space<vmem>>, vector<1x8x128xf32>
    %5 = vector.shape_cast %4 : vector<1x8x128xf32> to vector<8x128xf32>
    %c1 = arith.constant 1 : index
    %c0_3 = arith.constant 0 : index
    %c0_4 = arith.constant 0 : index
    %6 = vector.load %arg2[%c1, %c0_3, %c0_4] : memref<3x8x128xf32, #tpu.memory_space<vmem>>, vector<1x8x128xf32>
    %7 = vector.shape_cast %6 : vector<1x8x128xf32> to vector<8x128xf32>
    %c2 = arith.constant 2 : index
    %c0_5 = arith.constant 0 : index
    %c0_6 = arith.constant 0 : index
    %8 = vector.load %arg2[%c2, %c0_5, %c0_6] : memref<3x8x128xf32, #tpu.memory_space<vmem>>, vector<1x8x128xf32>
    %9 = vector.shape_cast %8 : vector<1x8x128xf32> to vector<8x128xf32>
    %10 = arith.mulf %5, %5 : vector<8x128xf32>
    %11 = arith.mulf %7, %7 : vector<8x128xf32>
    %12 = arith.addf %10, %11 : vector<8x128xf32>
    %13 = arith.mulf %9, %9 : vector<8x128xf32>
    %14 = arith.addf %12, %13 : vector<8x128xf32>
    %cst_7 = arith.constant 0.0145856412 : f32
    %15 = vector.broadcast %cst_7 : f32 to vector<8x128xf32>
    %16 = arith.mulf %5, %15 : vector<8x128xf32>
    %cst_8 = arith.constant 0.0417803787 : f32
    %17 = vector.broadcast %cst_8 : f32 to vector<8x128xf32>
    %18 = arith.mulf %7, %17 : vector<8x128xf32>
    %19 = arith.addf %16, %18 : vector<8x128xf32>
    %cst_9 = arith.constant 1.16285098 : f32
    %20 = vector.broadcast %cst_9 : f32 to vector<8x128xf32>
    %21 = arith.mulf %9, %20 : vector<8x128xf32>
    %22 = arith.addf %19, %21 : vector<8x128xf32>
    %23 = arith.subf %14, %22 : vector<8x128xf32>
    %cst_10 = arith.constant 0.338546187 : f32
    %24 = vector.broadcast %cst_10 : f32 to vector<8x128xf32>
    %25 = arith.addf %23, %24 : vector<8x128xf32>
    %cst_11 = arith.constant 0.72367394 : f32
    %26 = vector.broadcast %cst_11 : f32 to vector<8x128xf32>
    %27 = arith.mulf %5, %26 : vector<8x128xf32>
    %cst_12 = arith.constant 0.446073443 : f32
    %28 = vector.broadcast %cst_12 : f32 to vector<8x128xf32>
    %29 = arith.mulf %7, %28 : vector<8x128xf32>
    %30 = arith.addf %27, %29 : vector<8x128xf32>
    %cst_13 = arith.constant 0.238574654 : f32
    %31 = vector.broadcast %cst_13 : f32 to vector<8x128xf32>
    %32 = arith.mulf %9, %31 : vector<8x128xf32>
    %33 = arith.addf %30, %32 : vector<8x128xf32>
    %34 = arith.subf %14, %33 : vector<8x128xf32>
    %cst_14 = arith.constant 0.194901854 : f32
    %35 = vector.broadcast %cst_14 : f32 to vector<8x128xf32>
    %36 = arith.addf %34, %35 : vector<8x128xf32>
    %37 = arith.minimumf %25, %36 : vector<8x128xf32>
    %cst_15 = arith.constant 0.25087586 : f32
    %38 = vector.broadcast %cst_15 : f32 to vector<8x128xf32>
    %39 = arith.mulf %5, %38 : vector<8x128xf32>
    %cst_16 = arith.constant 1.23365796 : f32
    %40 = vector.broadcast %cst_16 : f32 to vector<8x128xf32>
    %41 = arith.mulf %7, %40 : vector<8x128xf32>
    %42 = arith.addf %39, %41 : vector<8x128xf32>
    %cst_17 = arith.constant 0.190012604 : f32
    %43 = vector.broadcast %cst_17 : f32 to vector<8x128xf32>
    %44 = arith.mulf %9, %43 : vector<8x128xf32>
    %45 = arith.addf %42, %44 : vector<8x128xf32>
    %46 = arith.subf %14, %45 : vector<8x128xf32>
    %cst_18 = arith.constant 0.40523988 : f32
    %47 = vector.broadcast %cst_18 : f32 to vector<8x128xf32>
    %48 = arith.addf %46, %47 : vector<8x128xf32>
    %49 = arith.minimumf %37, %48 : vector<8x128xf32>
    %cst_19 = arith.constant 1.96684301 : f32
    %50 = vector.broadcast %cst_19 : f32 to vector<8x128xf32>
    %51 = arith.mulf %5, %50 : vector<8x128xf32>
    %cst_20 = arith.constant 0.849642157 : f32
    %52 = vector.broadcast %cst_20 : f32 to vector<8x128xf32>
    %53 = arith.mulf %7, %52 : vector<8x128xf32>
    %54 = arith.addf %51, %53 : vector<8x128xf32>
    %cst_21 = arith.constant 1.66495812 : f32
    %55 = vector.broadcast %cst_21 : f32 to vector<8x128xf32>
    %56 = arith.mulf %9, %55 : vector<8x128xf32>
    %57 = arith.addf %54, %56 : vector<8x128xf32>
    %58 = arith.subf %14, %57 : vector<8x128xf32>
    %cst_22 = arith.constant 1.84061325 : f32
    %59 = vector.broadcast %cst_22 : f32 to vector<8x128xf32>
    %60 = arith.addf %58, %59 : vector<8x128xf32>
    %61 = arith.minimumf %49, %60 : vector<8x128xf32>
    %cst_23 = arith.constant 0.193222195 : f32
    %62 = vector.broadcast %cst_23 : f32 to vector<8x128xf32>
    %63 = arith.mulf %5, %62 : vector<8x128xf32>
    %cst_24 = arith.constant 0.454039723 : f32
    %64 = vector.broadcast %cst_24 : f32 to vector<8x128xf32>
    %65 = arith.mulf %7, %64 : vector<8x128xf32>
    %66 = arith.addf %63, %65 : vector<8x128xf32>
    %cst_25 = arith.constant 0.709147573 : f32
    %67 = vector.broadcast %cst_25 : f32 to vector<8x128xf32>
    %68 = arith.mulf %9, %67 : vector<8x128xf32>
    %69 = arith.addf %66, %68 : vector<8x128xf32>
    %70 = arith.subf %14, %69 : vector<8x128xf32>
    %cst_26 = arith.constant 0.186595306 : f32
    %71 = vector.broadcast %cst_26 : f32 to vector<8x128xf32>
    %72 = arith.addf %70, %71 : vector<8x128xf32>
    %73 = arith.minimumf %61, %72 : vector<8x128xf32>
    %cst_27 = arith.constant 1.34208071 : f32
    %74 = vector.broadcast %cst_27 : f32 to vector<8x128xf32>
    %75 = arith.mulf %5, %74 : vector<8x128xf32>
    %cst_28 = arith.constant 0.233926684 : f32
    %76 = vector.broadcast %cst_28 : f32 to vector<8x128xf32>
    %77 = arith.mulf %7, %76 : vector<8x128xf32>
    %78 = arith.addf %75, %77 : vector<8x128xf32>
    %cst_29 = arith.constant 0.944784045 : f32
    %79 = vector.broadcast %cst_29 : f32 to vector<8x128xf32>
    %80 = arith.mulf %9, %79 : vector<8x128xf32>
    %81 = arith.addf %78, %80 : vector<8x128xf32>
    %82 = arith.subf %14, %81 : vector<8x128xf32>
    %cst_30 = arith.constant 0.687130809 : f32
    %83 = vector.broadcast %cst_30 : f32 to vector<8x128xf32>
    %84 = arith.addf %82, %83 : vector<8x128xf32>
    %85 = arith.minimumf %73, %84 : vector<8x128xf32>
    %cst_31 = arith.constant 0.339040428 : f32
    %86 = vector.broadcast %cst_31 : f32 to vector<8x128xf32>
    %87 = arith.mulf %5, %86 : vector<8x128xf32>
    %cst_32 = arith.constant 0.0501383804 : f32
    %88 = vector.broadcast %cst_32 : f32 to vector<8x128xf32>
    %89 = arith.mulf %7, %88 : vector<8x128xf32>
    %90 = arith.addf %87, %89 : vector<8x128xf32>
    %cst_33 = arith.constant 0.268726975 : f32
    %91 = vector.broadcast %cst_33 : f32 to vector<8x128xf32>
    %92 = arith.mulf %9, %91 : vector<8x128xf32>
    %93 = arith.addf %90, %92 : vector<8x128xf32>
    %94 = arith.subf %14, %93 : vector<8x128xf32>
    %cst_34 = arith.constant 0.0474201143 : f32
    %95 = vector.broadcast %cst_34 : f32 to vector<8x128xf32>
    %96 = arith.addf %94, %95 : vector<8x128xf32>
    %97 = arith.minimumf %85, %96 : vector<8x128xf32>
    %cst_35 = arith.constant 0.747446656 : f32
    %98 = vector.broadcast %cst_35 : f32 to vector<8x128xf32>
    %99 = arith.mulf %5, %98 : vector<8x128xf32>
    %cst_36 = arith.constant 1.81658828 : f32
    %100 = vector.broadcast %cst_36 : f32 to vector<8x128xf32>
    %101 = arith.mulf %7, %100 : vector<8x128xf32>
    %102 = arith.addf %99, %101 : vector<8x128xf32>
    %cst_37 = arith.constant 1.58334219 : f32
    %103 = vector.broadcast %cst_37 : f32 to vector<8x128xf32>
    %104 = arith.mulf %9, %103 : vector<8x128xf32>
    %105 = arith.addf %102, %104 : vector<8x128xf32>
    %106 = arith.subf %14, %105 : vector<8x128xf32>
    %cst_38 = arith.constant 1.59141159 : f32
    %107 = vector.broadcast %cst_38 : f32 to vector<8x128xf32>
    %108 = arith.addf %106, %107 : vector<8x128xf32>
    %109 = arith.minimumf %97, %108 : vector<8x128xf32>
    %cst_39 = arith.constant 0.246525913 : f32
    %110 = vector.broadcast %cst_39 : f32 to vector<8x128xf32>
    %111 = arith.mulf %5, %110 : vector<8x128xf32>
    %cst_40 = arith.constant 0.586961627 : f32
    %112 = vector.broadcast %cst_40 : f32 to vector<8x128xf32>
    %113 = arith.mulf %7, %112 : vector<8x128xf32>
    %114 = arith.addf %111, %113 : vector<8x128xf32>
    %cst_41 = arith.constant 1.58080971 : f32
    %115 = vector.broadcast %cst_41 : f32 to vector<8x128xf32>
    %116 = arith.mulf %9, %115 : vector<8x128xf32>
    %117 = arith.addf %114, %116 : vector<8x128xf32>
    %118 = arith.subf %14, %117 : vector<8x128xf32>
    %cst_42 = arith.constant 0.726065636 : f32
    %119 = vector.broadcast %cst_42 : f32 to vector<8x128xf32>
    %120 = arith.addf %118, %119 : vector<8x128xf32>
    %121 = arith.minimumf %109, %120 : vector<8x128xf32>
    %cst_43 = arith.constant 1.90199316 : f32
    %122 = vector.broadcast %cst_43 : f32 to vector<8x128xf32>
    %123 = arith.mulf %5, %122 : vector<8x128xf32>
    %cst_44 = arith.constant 0.682310224 : f32
    %124 = vector.broadcast %cst_44 : f32 to vector<8x128xf32>
    %125 = arith.mulf %7, %124 : vector<8x128xf32>
    %126 = arith.addf %123, %125 : vector<8x128xf32>
    %cst_45 = arith.constant 1.04297388 : f32
    %127 = vector.broadcast %cst_45 : f32 to vector<8x128xf32>
    %128 = arith.mulf %9, %127 : vector<8x128xf32>
    %129 = arith.addf %126, %128 : vector<8x128xf32>
    %130 = arith.subf %14, %129 : vector<8x128xf32>
    %cst_46 = arith.constant 1.29273093 : f32
    %131 = vector.broadcast %cst_46 : f32 to vector<8x128xf32>
    %132 = arith.addf %130, %131 : vector<8x128xf32>
    %133 = arith.minimumf %121, %132 : vector<8x128xf32>
    %cst_47 = arith.constant 0.516731858 : f32
    %134 = vector.broadcast %cst_47 : f32 to vector<8x128xf32>
    %135 = arith.mulf %5, %134 : vector<8x128xf32>
    %cst_48 = arith.constant 0.0771264135 : f32
    %136 = vector.broadcast %cst_48 : f32 to vector<8x128xf32>
    %137 = arith.mulf %7, %136 : vector<8x128xf32>
    %138 = arith.addf %135, %137 : vector<8x128xf32>
    %cst_49 = arith.constant 0.832471489 : f32
    %139 = vector.broadcast %cst_49 : f32 to vector<8x128xf32>
    %140 = arith.mulf %9, %139 : vector<8x128xf32>
    %141 = arith.addf %138, %140 : vector<8x128xf32>
    %142 = arith.subf %14, %141 : vector<8x128xf32>
    %cst_50 = arith.constant 0.241493285 : f32
    %143 = vector.broadcast %cst_50 : f32 to vector<8x128xf32>
    %144 = arith.addf %142, %143 : vector<8x128xf32>
    %145 = arith.minimumf %133, %144 : vector<8x128xf32>
    %cst_51 = arith.constant 1.64369404 : f32
    %146 = vector.broadcast %cst_51 : f32 to vector<8x128xf32>
    %147 = arith.mulf %5, %146 : vector<8x128xf32>
    %cst_52 = arith.constant 0.193983704 : f32
    %148 = vector.broadcast %cst_52 : f32 to vector<8x128xf32>
    %149 = arith.mulf %7, %148 : vector<8x128xf32>
    %150 = arith.addf %147, %149 : vector<8x128xf32>
    %cst_53 = arith.constant 0.474682719 : f32
    %151 = vector.broadcast %cst_53 : f32 to vector<8x128xf32>
    %152 = arith.mulf %9, %151 : vector<8x128xf32>
    %153 = arith.addf %150, %152 : vector<8x128xf32>
    %154 = arith.subf %14, %153 : vector<8x128xf32>
    %cst_54 = arith.constant 0.741171896 : f32
    %155 = vector.broadcast %cst_54 : f32 to vector<8x128xf32>
    %156 = arith.addf %154, %155 : vector<8x128xf32>
    %157 = arith.minimumf %145, %156 : vector<8x128xf32>
    %cst_55 = arith.constant 0.000000e+00 : f32
    %158 = vector.broadcast %cst_55 : f32 to vector<8x128xf32>
    %159 = arith.maximumf %157, %158 : vector<8x128xf32>
    %160 = math.sqrt %159 : vector<8x128xf32>
    %161 = arith.addf %3, %160 : vector<8x128xf32>
    %c0_56 = arith.constant 0 : index
    %c0_57 = arith.constant 0 : index
    %c0_58 = arith.constant 0 : index
    %162 = vector.load %arg3[%c0_56, %c0_57, %c0_58] : memref<1x8x128xf32, #tpu.memory_space<vmem>>, vector<1x8x128xf32>
    %163 = vector.shape_cast %161 : vector<8x128xf32> to vector<1x8x128xf32>
    %164 = arith.addf %162, %163 : vector<1x8x128xf32>
    %c0_59 = arith.constant 0 : index
    %c0_60 = arith.constant 0 : index
    %c0_61 = arith.constant 0 : index
    %165 = vector.load %arg3[%c0_59, %c0_60, %c0_61] : memref<1x8x128xf32, #tpu.memory_space<vmem>>, vector<1x8x128xf32>
    tpu.vector_store %arg3[%c0_59, %c0_60, %c0_61], %164 {strides = array<i32>} : memref<1x8x128xf32, #tpu.memory_space<vmem>>, vector<1x8x128xf32>,
    return
  }
  func.func @transform_0(%arg0: i32, %arg1: i32) -> (i32, i32, i32) {
    %c1_i32 = arith.constant 1 : i32
    %0 = arith.muli %arg0, %c1_i32 : i32
    %1 = arith.addi %0, %arg1 : i32
    %c0_i32 = arith.constant 0 : i32
    %c0_i32_0 = arith.constant 0 : i32
    %c0_i32_1 = arith.constant 0 : i32
    return %c0_i32, %1, %c0_i32_0 : i32, i32, i32
  }
  func.func @transform_1(%arg0: i32, %arg1: i32) -> (i32, i32, i32) {
    %c0_i32 = arith.constant 0 : i32
    %c0_i32_0 = arith.constant 0 : i32
    %c0_i32_1 = arith.constant 0 : i32
    return %arg0, %c0_i32, %c0_i32_0 : i32, i32, i32
  }
}

</mosaic_0001>

<bundles_post_ra>
// kernel: nps.1
= control target key start
LH: loop header
LB: loop body
LE: loop exit
PB: predicated region body
PF: predicated region fallthrough
CT: control target
= control target key end

     0   :  { %s246_s0 = inlined_call_operand.vmem [shape: f32[3,8,128], index: 0, kind: input, shape index: {}]   ;;  %s247_s1 = inlined_call_operand.vmem [shape: f32[1,8,128], index: 1, kind: output, shape index: {}]  }
   0x1   :  { %v175_v0 = vld [vmem:[%s246_s0] sm:$0xff]  ;;  %v180_v1 = vld [vmem:[%s246_s0 + $0x8] sm:$0xff]  ;;  %v185_v2 = vld [vmem:[%s246_s0 + $0x10] sm:$0xff] }
   0x2   :  { %v35_v3 = vmul.f32 %v175_v0, %v175_v0  ;;  %v36_v4 = vmul.f32 %v180_v1, %v180_v1  ;;  %v38_v5 = vmul.f32 %v185_v2, %v185_v2  ;;  %v40_v6 = vmul.f32 0.014585641, %v175_v0 }
   0x3   :  { %v41_v7 = vmul.f32 0.04178038, %v180_v1  ;;  %v43_v8 = vmul.f32 1.162851, %v185_v2  ;;  %v47_v9 = vmul.f32 0.72367394, %v175_v0 }
   0x4   :  { %v37_v10 = vadd.f32 %v36_v4, %v35_v3  ;;  %v48_v11 = vmul.f32 0.44607344, %v180_v1  ;;  %v50_v12 = vmul.f32 0.23857465, %v185_v2  ;;  %v55_v13 = vmul.f32 0.25087586, %v175_v0 }
   0x5   :  { %v42_v14 = vadd.f32 %v41_v7, %v40_v6  ;;  %v56_v15 = vmul.f32 1.233658, %v180_v1  ;;  %v58_v16 = vmul.f32 0.1900126, %v185_v2  ;;  %v63_v17 = vmul.f32 1.966843, %v175_v0 }
   0x6   :  { %v203_v18 = vadd.f32 %v38_v5, %v37_v10  ;;  %v49_v19 = vadd.f32 %v48_v11, %v47_v9  ;;  %v64_v20 = vmul.f32 0.84964216, %v180_v1  ;;  %v66_v21 = vmul.f32 1.6649581, %v185_v2 }
   0x7   :  { %v44_v22 = vadd.f32 %v43_v8, %v42_v14  ;;  %v57_v23 = vadd.f32 %v56_v15, %v55_v13  ;;  %v71_v24 = vmul.f32 0.1932222, %v175_v0  ;;  %v72_v25 = vmul.f32 0.45403972, %v180_v1 }
   0x8   :  { %v51_v26 = vadd.f32 %v50_v12, %v49_v19  ;;  %v65_v27 = vadd.f32 %v64_v20, %v63_v17  ;;  %v74_v28 = vmul.f32 0.7091476, %v185_v2  ;;  %v79_v29 = vmul.f32 1.3420807, %v175_v0 }
   0x9   :  { %v45_v30 = vsub.f32 %v203_v18, %v44_v22  ;;  %v59_v31 = vadd.f32 %v58_v16, %v57_v23  ;;  %v73_v32 = vadd.f32 %v72_v25, %v71_v24  ;;  %v80_v33 = vmul.f32 0.23392668, %v180_v1 }
   0xa   :  { %v52_v34 = vsub.f32 %v203_v18, %v51_v26  ;;  %v67_v35 = vadd.f32 %v66_v21, %v65_v27  ;;  %v82_v36 = vmul.f32 0.94478405, %v185_v2  ;;  %v87_v37 = vmul.f32 0.33904043, %v175_v0 }
   0xb   :  { %v46_v38 = vadd.f32 0.3385462, %v45_v30  ;;  %v60_v39 = vsub.f32 %v203_v18, %v59_v31  ;;  %v75_v40 = vadd.f32 %v74_v28, %v73_v32  ;;  %v81_v41 = vadd.f32 %v80_v33, %v79_v29 }
   0xc   :  { %v53_v42 = vadd.f32 0.19490185, %v52_v34  ;;  %v68_v43 = vsub.f32 %v203_v18, %v67_v35  ;;  %v88_v44 = vmul.f32 0.05013838, %v180_v1  ;;  %v90_v45 = vmul.f32 0.26872697, %v185_v2 }
   0xd   :  { %v61_v46 = vadd.f32 0.40523988, %v60_v39  ;;  %v76_v47 = vsub.f32 %v203_v18, %v75_v40  ;;  %v83_v48 = vadd.f32 %v82_v36, %v81_v41  ;;  %v95_v49 = vmul.f32 0.74744666, %v175_v0 }
   0xe   :  { %v54_v50 = vmin.f32 %v46_v38, %v53_v42  ;;  %v69_v51 = vadd.f32 1.8406132, %v68_v43  ;;  %v89_v52 = vadd.f32 %v88_v44, %v87_v37  ;;  %v96_v53 = vmul.f32 1.8165883, %v180_v1 }
   0xf   :  { %v77_v54 = vadd.f32 0.1865953, %v76_v47  ;;  %v84_v55 = vsub.f32 %v203_v18, %v83_v48  ;;  %v98_v56 = vmul.f32 1.5833422, %v185_v2  ;;  %v103_v57 = vmul.f32 0.24652591, %v175_v0 }
  0x10   :  { %v62_v58 = vmin.f32 %v54_v50, %v61_v46  ;;  %v91_v59 = vadd.f32 %v90_v45, %v89_v52  ;;  %v97_v60 = vadd.f32 %v96_v53, %v95_v49  ;;  %v104_v61 = vmul.f32 0.5869616, %v180_v1 }
  0x11   :  { %v85_v62 = vadd.f32 0.6871308, %v84_v55  ;;  %v106_v63 = vmul.f32 1.5808097, %v185_v2  ;;  %v111_v3 = vmul.f32 1.9019932, %v175_v0 }
  0x12   :  { %v70_v4 = vmin.f32 %v62_v58, %v69_v51  ;;  %v92_v5 = vsub.f32 %v203_v18, %v91_v59  ;;  %v99_v6 = vadd.f32 %v98_v56, %v97_v60  ;;  %v105_v7 = vadd.f32 %v104_v61, %v103_v57 }
  0x13   :  { %v112_v8 = vmul.f32 0.6823102, %v180_v1  ;;  %v114_v9 = vmul.f32 1.0429739, %v185_v2  ;;  %v119_v10 = vmul.f32 0.51673186, %v175_v0 }
  0x14   :  { %v78_v11 = vmin.f32 %v70_v4, %v77_v54  ;;  %v93_v12 = vadd.f32 0.047420114, %v92_v5  ;;  %v100_v13 = vsub.f32 %v203_v18, %v99_v6  ;;  %v107_v14 = vadd.f32 %v106_v63, %v105_v7 }
  0x15   :  { %v113_v15 = vadd.f32 %v112_v8, %v111_v3  ;;  %v120_v16 = vmul.f32 0.07712641, %v180_v1  ;;  %v122_v17 = vmul.f32 0.8324715, %v185_v2  ;;  %v127_v19 = vmul.f32 1.643694, %v175_v0 }
  0x16   :  { %v86_v20 = vmin.f32 %v78_v11, %v85_v62  ;;  %v101_v21 = vadd.f32 1.5914116, %v100_v13  ;;  %v108_v22 = vsub.f32 %v203_v18, %v107_v14  ;;  %v128_v23 = vmul.f32 0.1939837, %v180_v1 }
  0x17   :  { %v115_v24 = vadd.f32 %v114_v9, %v113_v15  ;;  %v121_v25 = vadd.f32 %v120_v16, %v119_v10  ;;  %v130_v26 = vmul.f32 0.47468272, %v185_v2 }
  0x18   :  { %v94_v27 = vmin.f32 %v86_v20, %v93_v12  ;;  %v109_v28 = vadd.f32 0.72606564, %v108_v22  ;;  %v129_v29 = vadd.f32 %v128_v23, %v127_v19 }
  0x19   :  { %v116_v30 = vsub.f32 %v203_v18, %v115_v24  ;;  %v123_v31 = vadd.f32 %v122_v17, %v121_v25 }
  0x1a   :  { %v102_v32 = vmin.f32 %v94_v27, %v101_v21  ;;  %v131_v33 = vadd.f32 %v130_v26, %v129_v29 }
  0x1b   :  { %v117_v34 = vadd.f32 1.2927309, %v116_v30  ;;  %v124_v0 = vsub.f32 %v203_v18, %v123_v31 }
  0x1c   :  { %v110_v35 = vmin.f32 %v102_v32, %v109_v28  ;;  %v132_v36 = vsub.f32 %v203_v18, %v131_v33 }
  0x1d   :  { %v125_v37 = vadd.f32 0.24149328, %v124_v0 }
  0x1e   :  { %v118_v1 = vmin.f32 %v110_v35, %v117_v34  ;;  %v133_v38 = vadd.f32 0.7411719, %v132_v36 }
  0x20   :  { %v126_v39 = vmin.f32 %v118_v1, %v125_v37 }
  0x22   :  { %v134_v40 = vmin.f32 %v126_v39, %v133_v38 }
  0x24   :  { %v135_v2 = vmax.f32 %v134_v40, 0.0 }
  0x26   :  { %160 = vrsqrt.f32 %v135_v2  ;;  %vm138_vm0 = vcmp.eq.f32.partialorder %v135_v2, inf  ;;  %v141_v42 = vand.u32 2147483648, %v135_v2  ;;  %vm140_vm1 = vcmp.eq.f32.partialorder %v135_v2, 0.0 }
  0x33   :  { %v161_v41 = vpop.eup %160 }
  0x34   :  { %v137_v43 = vmul.f32 %v161_v41, %v135_v2 }
  0x36   :  { %v139_v44 = vsel %vm138_vm0, %v135_v2, %v137_v43 }
  0x37   :  { %v142_v45 = vsel %vm140_vm1, %v141_v42, %v139_v44 }
  0x38   :  { %146 = vst [vmem:[%s247_s1] sm:$0xff] %v142_v45 }

</bundles_post_ra>
